<compile_context>
chip_gen: v7x
topology: tpu7x:2x2x1
jax: 0.10.0
libtpu: 0.0.40
codegen_flags: <defaults>
</compile_context>

<pallas_src>
import jax
import jax.numpy as jnp
from jax.experimental import pallas as pl
from jax.experimental.pallas import tpu as pltpu


def _rope_kernel(cos_ref, sinl_ref, sinr_ref, x_ref, o_ref):
    # cos/sinl/sinr: (tile_r, L)    x/o: (tile_b, tile_r, L)
    x = x_ref[...].astype(jnp.float32)
    cos = cos_ref[...][None]       # (1, tile_r, L) -> broadcasts over tile_b
    sinl = sinl_ref[...][None]
    sinr = sinr_ref[...][None]
    # lane j <- x[j + 1] (wraps; wrap / cross-pair lanes have sinl == 0)
    shift_l = jnp.concatenate([x[..., 1:], x[..., :1]], axis=-1)
    # lane j <- x[j - 1] (wraps; wrap / cross-pair lanes have sinr == 0)
    shift_r = jnp.concatenate([x[..., -1:], x[..., :-1]], axis=-1)
    out = x * cos + shift_l * sinl + shift_r * sinr
    o_ref[...] = out.astype(o_ref.dtype)


def _build_tables(seq_len, dim):
    """cos / sign-baked sin tables, full feature width (seq_len, dim)."""
    inv_freq = 1.0 / (10000.0 ** (jnp.arange(0, dim, 2, dtype=jnp.float32) / dim))
    t = jnp.arange(seq_len, dtype=jnp.float32)
    freqs = t[:, None] * inv_freq[None, :]          # (S, dim//2)
    cos = jnp.cos(freqs)
    sin = jnp.sin(freqs)
    zeros = jnp.zeros_like(sin)
    cos_full = jnp.repeat(cos, 2, axis=-1)                            # [c0,c0,c1,c1,...]
    sin_l = jnp.stack([-sin, zeros], axis=-1).reshape(seq_len, dim)   # [-s0,0,-s1,0,...]
    sin_r = jnp.stack([zeros, sin], axis=-1).reshape(seq_len, dim)    # [ 0,s0, 0,s1,...]
    return cos_full, sin_l, sin_r


def rotary_embedding(x, dim, *, block_bytes=2 * 1024 * 1024,
                     vmem_limit_bytes=48 * 1024 * 1024):
    """Apply interleaved RoPE to x[..., :dim].  x shape: (..., seq, width)."""
    if x.ndim < 2:
        raise ValueError("x must have at least (seq, feature) dims")
    if dim % 2 != 0 or dim > x.shape[-1]:
        raise ValueError("dim must be even and <= x.shape[-1]")

    *lead, seq_len, width = x.shape
    # Features beyond `dim` are passed through unchanged (x_out.clone() semantics).
    x_rot = x[..., :dim] if width > dim else x
    x_rest = x[..., dim:] if width > dim else None

    batch = 1
    for s in lead:
        batch *= s
    x3 = x_rot.reshape(batch, seq_len, dim)

    cos_full, sin_l, sin_r = _build_tables(seq_len, dim)

    # Lane-density fold: pack `fold` consecutive seq positions into the lane
    # axis (contiguous -> free reshape) so the stored last dim is >= 128.
    fold = 1
    if dim < 128 and 128 % dim == 0 and seq_len % (128 // dim) == 0:
        fold = 128 // dim
    rows = seq_len // fold
    lanes = dim * fold
    x3 = x3.reshape(batch, rows, lanes)
    cos_full = cos_full.reshape(rows, lanes)
    sin_l = sin_l.reshape(rows, lanes)
    sin_r = sin_r.reshape(rows, lanes)

    # Tile selection: biggest row tile that fits the per-block VMEM budget
    # (mem-bound kernel -> few large DMAs beat a finer, serial grid).
    bytes_per_row = lanes * x.dtype.itemsize
    if rows * bytes_per_row <= block_bytes:
        tile_r = rows
        tile_b = max(1, min(batch, block_bytes // max(1, rows * bytes_per_row)))
    else:
        tile_r = max(8, (block_bytes // bytes_per_row) // 8 * 8)
        tile_r = min(tile_r, rows)
        tile_b = 1

    grid = (pl.cdiv(rows, tile_r), pl.cdiv(batch, tile_b))

    out3 = pl.pallas_call(
        _rope_kernel,
        out_shape=jax.ShapeDtypeStruct((batch, rows, lanes), x.dtype),
        grid=grid,
        in_specs=[
            pl.BlockSpec((tile_r, lanes), lambda r, b: (r, 0)),          # cos
            pl.BlockSpec((tile_r, lanes), lambda r, b: (r, 0)),          # sin (even lanes, -)
            pl.BlockSpec((tile_r, lanes), lambda r, b: (r, 0)),          # sin (odd lanes, +)
            pl.BlockSpec((tile_b, tile_r, lanes), lambda r, b: (b, r, 0)),  # x
        ],
        out_specs=pl.BlockSpec((tile_b, tile_r, lanes), lambda r, b: (b, r, 0)),
        compiler_params=pltpu.CompilerParams(
            dimension_semantics=("parallel", "parallel"),
            vmem_limit_bytes=vmem_limit_bytes,
        ),
    )(cos_full, sin_l, sin_r, x3)

    out = out3.reshape(batch, seq_len, dim).reshape(*lead, seq_len, dim)
    if x_rest is not None:
        out = jnp.concatenate([out, x_rest], axis=-1)
    return out


if __name__ == "__main__":
    key = jax.random.PRNGKey(0)
    batch, seq, dim = 2, 8, 32
    x = jax.random.normal(key, (batch, seq, dim), dtype=jnp.float32)

    out = jax.block_until_ready(rotary_embedding(x, dim))

    # Plain-JAX reference mirroring the PyTorch forward.
    inv_freq = 1.0 / (10000.0 ** (jnp.arange(0, dim, 2, dtype=jnp.float32) / dim))
    t = jnp.arange(seq, dtype=jnp.float32)
    freqs = t[:, None] * inv_freq[None, :]
    cos = jnp.cos(freqs)[None]     # (1, seq, dim//2)
    sin = jnp.sin(freqs)[None]
    xr = x.reshape(batch, seq, dim // 2, 2)
    x_even, x_odd = xr[..., 0], xr[..., 1]
    ref = jnp.stack(
        [x_even * cos - x_odd * sin, x_even * sin + x_odd * cos], axis=-1
    ).reshape(batch, seq, dim)

    assert out.shape == x.shape and out.dtype == x.dtype
    assert jnp.allclose(out, ref, atol=1e-5, rtol=1e-5)
    print("KERNEL_OK")
</pallas_src>

<mosaic_0001>
module attributes {stable_mosaic.version = 11 : i64} {
  func.func @_rope_kernel(%arg0: i32, %arg1: i32, %arg2: memref<2x128xf32, #tpu.memory_space<vmem>>, %arg3: memref<2x128xf32, #tpu.memory_space<vmem>>, %arg4: memref<2x128xf32, #tpu.memory_space<vmem>>, %arg5: memref<2x2x128xf32, #tpu.memory_space<vmem>>, %arg6: memref<2x2x128xf32, #tpu.memory_space<vmem>>) attributes {dimension_semantics = [#tpu.dimension_semantics<parallel>, #tpu.dimension_semantics<parallel>], iteration_bounds = array<i64: 1, 1>, scalar_prefetch = 0 : i64, scratch_operands = 0 : i64, tpu.core_type = #tpu.core_type<tc>, window_params = [{transform_indices = @transform_0, window_bounds = array<i64: 2, 128>}, {transform_indices = @transform_1, window_bounds = array<i64: 2, 128>}, {transform_indices = @transform_2, window_bounds = array<i64: 2, 128>}, {transform_indices = @transform_3, window_bounds = array<i64: 2, 2, 128>}, {transform_indices = @transform_4, window_bounds = array<i64: 2, 2, 128>}]} {
    %c0 = arith.constant 0 : index
    %c0_0 = arith.constant 0 : index
    %c0_1 = arith.constant 0 : index
    %0 = vector.load %arg5[%c0, %c0_0, %c0_1] : memref<2x2x128xf32, #tpu.memory_space<vmem>>, vector<2x2x128xf32>
    %c0_2 = arith.constant 0 : index
    %c0_3 = arith.constant 0 : index
    %1 = vector.load %arg2[%c0_2, %c0_3] : memref<2x128xf32, #tpu.memory_space<vmem>>, vector<2x128xf32>
    %2 = vector.shape_cast %1 : vector<2x128xf32> to vector<1x2x128xf32>
    %c0_4 = arith.constant 0 : index
    %c0_5 = arith.constant 0 : index
    %3 = vector.load %arg3[%c0_4, %c0_5] : memref<2x128xf32, #tpu.memory_space<vmem>>, vector<2x128xf32>
    %4 = vector.shape_cast %3 : vector<2x128xf32> to vector<1x2x128xf32>
    %c0_6 = arith.constant 0 : index
    %c0_7 = arith.constant 0 : index
    %5 = vector.load %arg4[%c0_6, %c0_7] : memref<2x128xf32, #tpu.memory_space<vmem>>, vector<2x128xf32>
    %6 = vector.shape_cast %5 : vector<2x128xf32> to vector<1x2x128xf32>
    %7 = vector.extract_strided_slice %0 {offsets = [0, 0, 1], sizes = [2, 2, 127], strides = [1, 1, 1]} : vector<2x2x128xf32> to vector<2x2x127xf32>
    %8 = vector.extract_strided_slice %0 {offsets = [0, 0, 0], sizes = [2, 2, 1], strides = [1, 1, 1]} : vector<2x2x128xf32> to vector<2x2x1xf32>
    %9 = tpu.concatenate %7, %8 in 2 : vector<2x2x127xf32>, vector<2x2x1xf32> -> vector<2x2x128xf32>
    %10 = vector.extract_strided_slice %0 {offsets = [0, 0, 127], sizes = [2, 2, 1], strides = [1, 1, 1]} : vector<2x2x128xf32> to vector<2x2x1xf32>
    %11 = vector.extract_strided_slice %0 {offsets = [0, 0, 0], sizes = [2, 2, 127], strides = [1, 1, 1]} : vector<2x2x128xf32> to vector<2x2x127xf32>
    %12 = tpu.concatenate %10, %11 in 2 : vector<2x2x1xf32>, vector<2x2x127xf32> -> vector<2x2x128xf32>
    %13 = vector.broadcast %2 : vector<1x2x128xf32> to vector<2x2x128xf32>
    %14 = arith.mulf %0, %13 : vector<2x2x128xf32>
    %15 = vector.broadcast %4 : vector<1x2x128xf32> to vector<2x2x128xf32>
    %16 = arith.mulf %9, %15 : vector<2x2x128xf32>
    %17 = arith.addf %14, %16 : vector<2x2x128xf32>
    %18 = vector.broadcast %6 : vector<1x2x128xf32> to vector<2x2x128xf32>
    %19 = arith.mulf %12, %18 : vector<2x2x128xf32>
    %20 = arith.addf %17, %19 : vector<2x2x128xf32>
    %c0_8 = arith.constant 0 : index
    %c0_9 = arith.constant 0 : index
    %c0_10 = arith.constant 0 : index
    %21 = vector.load %arg6[%c0_8, %c0_9, %c0_10] : memref<2x2x128xf32, #tpu.memory_space<vmem>>, vector<2x2x128xf32>
    tpu.vector_store %arg6[%c0_8, %c0_9, %c0_10], %20 {strides = array<i32>} : memref<2x2x128xf32, #tpu.memory_space<vmem>>, vector<2x2x128xf32>,
    return
  }
  func.func @transform_0(%arg0: i32, %arg1: i32) -> (i32, i32) {
    %c0_i32 = arith.constant 0 : i32
    %c0_i32_0 = arith.constant 0 : i32
    return %arg0, %c0_i32 : i32, i32
  }
  func.func @transform_1(%arg0: i32, %arg1: i32) -> (i32, i32) {
    %c0_i32 = arith.constant 0 : i32
    %c0_i32_0 = arith.constant 0 : i32
    return %arg0, %c0_i32 : i32, i32
  }
  func.func @transform_2(%arg0: i32, %arg1: i32) -> (i32, i32) {
    %c0_i32 = arith.constant 0 : i32
    %c0_i32_0 = arith.constant 0 : i32
    return %arg0, %c0_i32 : i32, i32
  }
  func.func @transform_3(%arg0: i32, %arg1: i32) -> (i32, i32, i32) {
    %c0_i32 = arith.constant 0 : i32
    %c0_i32_0 = arith.constant 0 : i32
    return %arg1, %arg0, %c0_i32 : i32, i32, i32
  }
  func.func @transform_4(%arg0: i32, %arg1: i32) -> (i32, i32, i32) {
    %c0_i32 = arith.constant 0 : i32
    %c0_i32_0 = arith.constant 0 : i32
    return %arg1, %arg0, %c0_i32 : i32, i32, i32
  }
}

</mosaic_0001>

<bundles_post_ra>
// kernel: tpu_custom_call.1
= control target key start
LH: loop header
LB: loop body
LE: loop exit
PB: predicated region body
PF: predicated region fallthrough
CT: control target
= control target key end

     0   :  { %9 = vsyncpa [#allocation3], 0  ;;  %s247_s0 = inlined_call_operand.hbm [shape: f32[2,128], index: 0, kind: input, shape index: {}]   ;;  %s248_s1 = inlined_call_operand.vmem [shape: f32[2,128], index: 1, kind: input, shape index: {}]   ;;  %s249_s2 = inlined_call_operand.hbm [shape: f32[2,128], index: 2, kind: input, shape index: {}]   ;;  %s250_s3 = inlined_call_operand.vmem [shape: f32[2,2,128], index: 3, kind: input, shape index: {}]   ;;  %s251_s4 = inlined_call_operand.hbm [shape: f32[2,2,128], index: 4, kind: output, shape index: {}]  }
   0x1   :  { %10 = vsyncpa [#allocation6], 0 }
   0x2   :  { %11 = vsyncpa [#allocation4], 0  ;;  %s170_s15 = smov [#allocation2]   ;;  %s171_s17 = smov [#allocation5]  }
   0x3   :  { %s18_s16 = sshll.u32 %s170_s15, 4  ;;  %s30_s18 = sshll.u32 %s171_s17, 4  ;;  %s19_s16 = int_to_ptr.vmem [resolvable:$true] %s18_s16  ;;  %s31_s18 = int_to_ptr.vmem [resolvable:$true] %s30_s18 }
   0x4   :  { %s98_s21 = scalar_lea.hbm %s247_s0, 32 }
   0x5   :  { %p99_p0 = scmp.ne.s32.totalorder %s247_s0, %s98_s21  ;;  %p102_p1 = scmp.lt.u32.totalorder %s98_s21, %s247_s0 }
   0x7   :  { %p104_p2 = pnand %p102_p1, %p99_p0 }
   0x9   :  { %107 = shalt.err (!%p104_p2)
}
   0xa   :  { %s108_s26 = scalar_lea.vmem %s19_s16, 32  ;;  %p113_p4 = scmp.lt.s32.totalorder %s19_s16, %s19_s16 }
   0xb   :  { %p109_p3 = scmp.ne.s32.totalorder %s19_s16, %s108_s26  ;;  %p114_p5 = scmp.lt.s32.totalorder %s108_s26, %s108_s26 }
   0xd   :  { %p115_p6 = por %p114_p5, %p113_p4 }
   0xf   :  { %p116_p7 = pnand %p115_p6, %p109_p3 }
  0x11   :  { %119 = shalt.err (!%p116_p7)
}
  0x12   :  { %21 = dma.hbm_to_vmem [thread:$0]  %s247_s0, 32, %s19_s16, [#allocation3]  }
  0x13   :  { %s120_s5 = scalar_lea.hbm %s249_s2, 32 }
  0x14   :  { %p121_p8 = scmp.ne.s32.totalorder %s249_s2, %s120_s5  ;;  %p124_p9 = scmp.lt.u32.totalorder %s120_s5, %s249_s2 }
  0x16   :  { %p126_p10 = pnand %p124_p9, %p121_p8 }
  0x18   :  { %129 = shalt.err (!%p126_p10)
}
  0x19   :  { %s130_s10 = scalar_lea.vmem %s31_s18, 32  ;;  %p135_p12 = scmp.lt.s32.totalorder %s31_s18, %s31_s18 }
  0x1a   :  { %p131_p11 = scmp.ne.s32.totalorder %s31_s18, %s130_s10  ;;  %p136_p13 = scmp.lt.s32.totalorder %s130_s10, %s130_s10 }
  0x1c   :  { %p137_p0 = por %p136_p13, %p135_p12 }
  0x1e   :  { %p138_p1 = pnand %p137_p0, %p131_p11 }
  0x20   :  { %141 = shalt.err (!%p138_p1)
}
  0x21   :  { %33 = dma.hbm_to_vmem [thread:$0]  %s249_s2, 32, %s31_s18, [#allocation6]  }
  0x22   :  { %164 = dma.done.wait [#allocation3], 32  }
  0x23   :  { %165 = vsyncadd [#allocation3], 4294967264 }
  0x24   :  { %166 = dma.done.wait [#allocation6], 32  }
  0x25   :  { %167 = vsyncadd [#allocation6], 4294967264  ;;  %v42_v0 = vld [vmem:[%s250_s3] sm:$0x3]  ;;  %s172_s14 = smov 127   ;;  %s173_s15 = smov 1  }
  0x26   :  { %49 = vrot.lane.b32.xlu0 %v42_v0, %s172_s14  ;;  %55 = vrot.lane.b32.xlu1 %v42_v0, %s173_s15  ;;  %v43_v1 = vld [vmem:[%s250_s3 + $0x2] sm:$0x3]  ;;  %v44_v2 = vld [vmem:[#allocation2] sm:$0x3]  ;;  %v45_v3 = vld [vmem:[%s248_s1] sm:$0x3] }
  0x27   :  { %v46_v4 = vld [vmem:[#allocation5] sm:$0x3]  ;;  %v61_v5 = vmul.f32 %v44_v2, %v42_v0  ;;  %v62_v10 = vmul.f32 %v44_v2, %v43_v1  ;;  %s174_s3 = smov [#allocation7]  }
  0x28   :  { %s78_s19 = sshll.u32 %s174_s3, 4  ;;  %s79_s19 = int_to_ptr.vmem [resolvable:$true] %s78_s19 }
  0x29   :  { %s142_s1 = scalar_lea.vmem %s79_s19, 64  ;;  %p147_p3 = scmp.lt.s32.totalorder %s79_s19, %s79_s19 }
  0x2a   :  { %51 = vrot.lane.b32.xlu0 %v43_v1, %s172_s14  ;;  %57 = vrot.lane.b32.xlu1 %v43_v1, %s173_s15  ;;  %p143_p2 = scmp.ne.s32.totalorder %s79_s19, %s142_s1  ;;  %p148_p4 = scmp.lt.s32.totalorder %s142_s1, %s142_s1 }
  0x2c   :  { %p149_p5 = por %p148_p4, %p147_p3 }
  0x2e   :  { %p150_p6 = pnand %p149_p5, %p143_p2 }
  0x98   :  { %v50_v6 = vpop.permute.xlu0 %49  ;;  %v56_v7 = vpop.permute.xlu1 %55 }
  0x99   :  { %v63_v8 = vmul.f32 %v50_v6, %v45_v3  ;;  %v67_v9 = vmul.f32 %v56_v7, %v46_v4 }
  0x9b   :  { %v65_v11 = vadd.f32 %v63_v8, %v61_v5 }
  0x9c   :  { %v52_v12 = vpop.permute.xlu0 %51  ;;  %v58_v13 = vpop.permute.xlu1 %57 }
  0x9d   :  { %v69_v14 = vadd.f32 %v67_v9, %v65_v11  ;;  %v64_v15 = vmul.f32 %v52_v12, %v45_v3  ;;  %v68_v16 = vmul.f32 %v58_v13, %v46_v4 }
  0x9f   :  { %71 = vst [vmem:[#allocation7] sm:$0x3] %v69_v14  ;;  %v66_v17 = vadd.f32 %v64_v15, %v62_v10 }
  0xa1   :  { %v70_v18 = vadd.f32 %v68_v16, %v66_v17 }
  0xa3   :  { %72 = vst [vmem:[#allocation7 + $0x2] sm:$0x3] %v70_v18 }
  0xa4   :  { %153 = shalt.err (!%p150_p6)
}
  0xa5   :  { %s154_s22 = scalar_lea.hbm %s251_s4, 64 }
  0xa6   :  { %p155_p7 = scmp.ne.s32.totalorder %s251_s4, %s154_s22  ;;  %p158_p8 = scmp.lt.u32.totalorder %s154_s22, %s251_s4 }
  0xa8   :  { %p160_p9 = pnand %p158_p8, %p155_p7 }
  0xaa   :  { %163 = shalt.err (!%p160_p9)
}
  0xab   :  { %s175_s27 = smov 32   ;;  %s176_s28 = smov 2  }
  0xac   :  { %84 = dma.vmem_to_hbm [thread:$0]  %s79_s19, 64, %s251_s4, [#allocation4], %s175_s27, %s175_s27, %s176_s28  }
  0xad   :  { %168 = dma.done.wait [#allocation4], 64  }
  0xae   :  { %169 = vsyncadd [#allocation4], 4294967232 }
  0xaf   :  { %88 = vsyncpa [#allocation3], 1 }
  0xb0   :  { %89 = vsyncpa [#allocation6], 1 }
  0xb1   :  { %90 = vsyncpa [#allocation4], 1 }

</bundles_post_ra>
